<compile_context>
chip_gen: v7x
topology: tpu7x:2x2x1
jax: 0.10.0
libtpu: 0.0.40
codegen_flags: <defaults>
</compile_context>

<pallas_src>
import jax
import jax.numpy as jnp
from jax.experimental import pallas as pl
from jax.experimental.pallas import tpu as pltpu


WIDE_LANES = 1024            # preferred lane-dense last dim
NARROW_LANES = 128           # minimum lane-dense last dim
SMALL_MAX_ELEMS = 32 * 1024  # <= ~128 KiB (f32): single un-gridded block
TARGET_MIN_STEPS = 4         # keep at least ~4 pipeline steps on the tiled path


def _add_const_kernel(x_ref, o_ref):
    # ((x + 3) * 2 - 1) / 2 folded into one VPU add.
    o_ref[...] = x_ref[...].astype(o_ref.dtype) + 2.5


def _round_up(n, m):
    return -(-n // m) * m


def _vmem_capacity_bytes():
    """Best-effort physical VMEM query; None if unavailable."""
    try:
        info = pltpu.get_tpu_info()
    except Exception:
        return None
    for name in ("vmem_capacity_bytes", "vmem_bytes", "vmem_size_bytes"):
        v = getattr(info, name, None)
        if isinstance(v, int) and v > 0:
            return v
    return None


def _chip_block_budget():
    """Return (block_bytes, vmem_limit_bytes) tuned per TPU generation."""
    vmem = _vmem_capacity_bytes()
    if vmem is not None and vmem <= (64 << 20):
        # v7x-class: 64 MiB VMEM but ~3.2 TB/s HBM -> bigger blocks amortize the
        # ~0.35us/step pipeline overhead; explicit limit leaves headroom.
        return 8 << 20, 40 << 20
    # v5e / v6e (128 MiB physical VMEM).  4 MiB block x (in+out) x 2 buffers =
    # 16 MiB, which exactly hits v5e's 16 MiB default scoped limit -> raise it
    # explicitly (safe: physical VMEM is 128 MiB on both).
    return 4 << 20, 32 << 20


def _single_block_call(x2d, out_dtype):
    # Tiny inputs: one full-array block, no grid, no pipeline machinery.
    return pl.pallas_call(
        _add_const_kernel,
        out_shape=jax.ShapeDtypeStruct(x2d.shape, out_dtype),
    )(x2d)


def _tiled_call(x2d, out_dtype, block_rows, vmem_limit):
    rows, lanes = x2d.shape
    grid = (pl.cdiv(rows, block_rows),)
    return pl.pallas_call(
        _add_const_kernel,
        out_shape=jax.ShapeDtypeStruct((rows, lanes), out_dtype),
        grid=grid,
        in_specs=[pl.BlockSpec((block_rows, lanes), lambda i: (i, 0))],
        out_specs=pl.BlockSpec((block_rows, lanes), lambda i: (i, 0)),
        compiler_params=pltpu.CompilerParams(
            dimension_semantics=("parallel",),
            vmem_limit_bytes=vmem_limit,
        ),
    )(x2d)


def pt_module_forward(x):
    """y = ((x + 3) * 2 - 1) / 2 elementwise via a Pallas TPU kernel."""
    orig_shape = x.shape
    # torch's `/ 2` is true division: integer/bool inputs promote to float32.
    out_dtype = x.dtype if jnp.issubdtype(x.dtype, jnp.floating) else jnp.float32
    total = x.size

    if total == 0:
        return jnp.zeros(orig_shape, out_dtype)

    x_flat = x.reshape(-1)

    if total <= SMALL_MAX_ELEMS:
        # ---- small path: single un-gridded block (pad to 128 lanes if needed) ----
        lanes = NARROW_LANES
        padded = _round_up(total, lanes)
        xf = x_flat if padded == total else jnp.pad(x_flat, (0, padded - total))
        out2d = _single_block_call(xf.reshape(padded // lanes, lanes), out_dtype)
        out_flat = out2d.reshape(-1)
        if padded != total:
            out_flat = out_flat[:total]
        return out_flat.reshape(orig_shape)

    # ---- tiled path: lane-dense slab, ragged last block, no block padding ----
    if total % WIDE_LANES == 0:
        lanes, padded, xf = WIDE_LANES, total, x_flat
    elif total % NARROW_LANES == 0:
        lanes, padded, xf = NARROW_LANES, total, x_flat
    else:
        # TODO(synk): for a <128-element remainder we could run the kernel on
        # the 128-aligned prefix and do the tail in plain JAX to save the
        # pad + slice HBM passes; kept simple here.
        lanes = NARROW_LANES
        padded = _round_up(total, lanes)
        xf = jnp.pad(x_flat, (0, padded - total))

    rows = padded // lanes
    dtype_bytes = jnp.dtype(x.dtype).itemsize
    block_bytes, vmem_limit = _chip_block_budget()
    block_rows_max = max(8, (block_bytes // (lanes * dtype_bytes)) // 8 * 8)
    # Shrink the block so the pipeline has at least ~TARGET_MIN_STEPS steps.
    block_rows = min(block_rows_max,
                     max(8, _round_up(-(-rows // TARGET_MIN_STEPS), 8)))

    out2d = _tiled_call(xf.reshape(rows, lanes), out_dtype, block_rows, vmem_limit)
    out_flat = out2d.reshape(-1)
    if padded != total:
        out_flat = out_flat[:total]
    return out_flat.reshape(orig_shape)


def _reference(x):
    return ((x + 3.0) * 2.0 - 1.0) / 2.0


if __name__ == "__main__":
    key = jax.random.PRNGKey(0)
    k1, k2, k3, k4 = jax.random.split(key, 4)

    # Primary test: small NCHW input consistent with the module's forward.
    x = jax.random.normal(k1, (2, 4, 16, 16), dtype=jnp.float32)
    y = pt_module_forward(x)
    jax.block_until_ready(y)
    assert y.shape == x.shape and y.dtype == x.dtype
    assert jnp.allclose(y, _reference(x), atol=1e-5, rtol=1e-6)

    # Non-128-aligned shape (exercises small-path padding).
    x_odd = jax.random.normal(k2, (3, 5, 7, 11), dtype=jnp.float32)
    y_odd = pt_module_forward(x_odd)
    jax.block_until_ready(y_odd)
    assert y_odd.shape == x_odd.shape
    assert jnp.allclose(y_odd, _reference(x_odd), atol=1e-5, rtol=1e-6)

    # Large input, divisible by 1024 -> wide-lane tiled path, no padding.
    x_big = jax.random.normal(k3, (4, 16, 128, 128), dtype=jnp.float32)
    y_big = pt_module_forward(x_big)
    jax.block_until_ready(y_big)
    assert y_big.shape == x_big.shape
    assert jnp.allclose(y_big, _reference(x_big), atol=1e-5, rtol=1e-6)

    # Divisible by 128 but not 1024 -> narrow-lane tiled path with a ragged
    # last block (no padding, no output slice).
    x_rag = jax.random.normal(k4, (1, 2, 257, 64), dtype=jnp.float32)
    y_rag = pt_module_forward(x_rag)
    jax.block_until_ready(y_rag)
    assert y_rag.shape == x_rag.shape
    assert jnp.allclose(y_rag, _reference(x_rag), atol=1e-5, rtol=1e-6)

    # Integer input: torch true-division promotes to float32.
    x_int = jax.random.randint(k1, (2, 4, 16, 16), -50, 50, dtype=jnp.int32)
    y_int = pt_module_forward(x_int)
    jax.block_until_ready(y_int)
    assert y_int.dtype == jnp.float32
    assert jnp.allclose(y_int, x_int.astype(jnp.float32) + 2.5)

    print("KERNEL_OK")
</pallas_src>

<mosaic_0001>
module attributes {stable_mosaic.version = 11 : i64} {
  func.func @_add_const_kernel(%arg0: memref<16x128xf32, #tpu.memory_space<vmem>>, %arg1: memref<16x128xf32, #tpu.memory_space<vmem>>) attributes {dimension_semantics = [], scalar_prefetch = 0 : i64, scratch_operands = 0 : i64, tpu.core_type = #tpu.core_type<tc>} {
    %c0 = arith.constant 0 : index
    %c0_0 = arith.constant 0 : index
    %0 = vector.load %arg0[%c0, %c0_0] : memref<16x128xf32, #tpu.memory_space<vmem>>, vector<16x128xf32>
    %cst = arith.constant 2.500000e+00 : f32
    %1 = vector.broadcast %cst : f32 to vector<16x128xf32>
    %2 = arith.addf %0, %1 : vector<16x128xf32>
    %c0_1 = arith.constant 0 : index
    %c0_2 = arith.constant 0 : index
    %3 = vector.load %arg1[%c0_1, %c0_2] : memref<16x128xf32, #tpu.memory_space<vmem>>, vector<16x128xf32>
    tpu.vector_store %arg1[%c0_1, %c0_2], %2 {strides = array<i32>} : memref<16x128xf32, #tpu.memory_space<vmem>>, vector<16x128xf32>,
    return
  }
}

</mosaic_0001>

<bundles_post_ra>
// kernel: tpu_custom_call.1
= control target key start
LH: loop header
LB: loop body
LE: loop exit
PB: predicated region body
PF: predicated region fallthrough
CT: control target
= control target key end

     0   :  { %6 = vsyncpa [#allocation3], 0  ;;  %s136_s0 = inlined_call_operand.hbm [shape: f32[16,128], index: 0, kind: input, shape index: {}]   ;;  %s137_s1 = inlined_call_operand.hbm [shape: f32[16,128], index: 1, kind: output, shape index: {}]  }
   0x1   :  { %7 = vsyncpa [#allocation4], 0  ;;  %s98_s6 = smov [#allocation2]   ;;  %s50_s10 = scalar_lea.hbm %s136_s0, 256 }
   0x2   :  { %s13_s7 = sshll.u32 %s98_s6, 4  ;;  %p51_p0 = scmp.ne.s32.totalorder %s136_s0, %s50_s10  ;;  %s14_s7 = int_to_ptr.vmem [resolvable:$true] %s13_s7 }
   0x3   :  { %p54_p1 = scmp.lt.u32.totalorder %s50_s10, %s136_s0 }
   0x5   :  { %p56_p2 = pnand %p54_p1, %p51_p0 }
   0x7   :  { %59 = shalt.err (!%p56_p2)
}
   0x8   :  { %s60_s15 = scalar_lea.vmem %s14_s7, 256  ;;  %p65_p4 = scmp.lt.s32.totalorder %s14_s7, %s14_s7 }
   0x9   :  { %p61_p3 = scmp.ne.s32.totalorder %s14_s7, %s60_s15  ;;  %p66_p5 = scmp.lt.s32.totalorder %s60_s15, %s60_s15 }
   0xb   :  { %p67_p6 = por %p66_p5, %p65_p4 }
   0xd   :  { %p68_p7 = pnand %p67_p6, %p61_p3 }
   0xf   :  { %71 = shalt.err (!%p68_p7)
}
  0x10   :  { %s99_s16 = smov 128   ;;  %s100_s17 = smov 8  }
  0x11   :  { %19 = dma.hbm_to_vmem [thread:$0]  %s136_s0, 256, %s14_s7, [#allocation3], %s99_s16, %s99_s16, %s100_s17  }
  0x12   :  { %94 = dma.done.wait [#allocation3], 256  }
  0x13   :  { %95 = vsyncadd [#allocation3], 4294967040  ;;  %s101_s20 = smov [#allocation5]   ;;  %v23_v0 = vld [vmem:[#allocation2] sm:$0xff]  ;;  %v24_v1 = vld [vmem:[#allocation2 + $0x8] sm:$0xff] }
  0x14   :  { %s34_s21 = sshll.u32 %s101_s20, 4  ;;  %v25_v2 = vadd.f32 2.5, %v23_v0  ;;  %v26_v3 = vadd.f32 2.5, %v24_v1  ;;  %s35_s21 = int_to_ptr.vmem [resolvable:$true] %s34_s21 }
  0x15   :  { %s72_s22 = scalar_lea.vmem %s35_s21, 256  ;;  %p77_p9 = scmp.lt.s32.totalorder %s35_s21, %s35_s21 }
  0x16   :  { %27 = vst [vmem:[#allocation5] sm:$0xff] %v25_v2  ;;  %28 = vst [vmem:[#allocation5 + $0x8] sm:$0xff] %v26_v3  ;;  %p73_p8 = scmp.ne.s32.totalorder %s35_s21, %s72_s22  ;;  %p78_p10 = scmp.lt.s32.totalorder %s72_s22, %s72_s22 }
  0x18   :  { %p79_p11 = por %p78_p10, %p77_p9 }
  0x1a   :  { %p80_p12 = pnand %p79_p11, %p73_p8 }
  0x1c   :  { %83 = shalt.err (!%p80_p12)
}
  0x1d   :  { %s84_s24 = scalar_lea.hbm %s137_s1, 256 }
  0x1e   :  { %p85_p13 = scmp.ne.s32.totalorder %s137_s1, %s84_s24  ;;  %p88_p0 = scmp.lt.u32.totalorder %s84_s24, %s137_s1 }
  0x20   :  { %p90_p1 = pnand %p88_p0, %p85_p13 }
  0x22   :  { %93 = shalt.err (!%p90_p1)
}
  0x23   :  { %40 = dma.vmem_to_hbm [thread:$0]  %s35_s21, 256, %s137_s1, [#allocation4], %s99_s16, %s99_s16, %s100_s17  }
  0x24   :  { %96 = dma.done.wait [#allocation4], 256  }
  0x25   :  { %97 = vsyncadd [#allocation4], 4294967040 }
  0x26   :  { %44 = vsyncpa [#allocation3], 1 }
  0x27   :  { %45 = vsyncpa [#allocation4], 1 }

</bundles_post_ra>
